<compile_context>
chip_gen: v5e
topology: v5e:2x2
jax: 0.10.0
libtpu: 0.0.40
codegen_flags: <defaults>
</compile_context>

<pallas_src>
import functools

import jax
import jax.numpy as jnp
from jax import lax
from jax.experimental import pallas as pl
from jax.experimental.pallas import tpu as pltpu


def ge2e_kernel(emb_ref, w_ref, b_ref, loss_ref, *, N, M):
    # ---- scalar path first (SMEM reads before any vector work) -------------
    w = w_ref[0]
    b = b_ref[0]

    NM = N * M
    _, D = emb_ref.shape

    inv_M = 1.0 / M
    inv_Mm1 = 1.0 / (M - 1 + 1e-6)     # matches the torch reference exactly
    Mf = float(M)
    eps2 = (1e-8) ** 2                 # F.cosine_similarity eps, squared

    e = emb_ref[...].astype(jnp.float32)               # (NM, D)

    # Speaker-assignment masks from range compares (VPU only, no int division).
    # Transposed float mask (N, NM) feeds the centroid matmul in the natural
    # (contract over rows) layout -> no hidden XLU transpose of e.
    r_t = lax.broadcasted_iota(jnp.int32, (N, NM), 1)   # utterance/row index
    s_t = lax.broadcasted_iota(jnp.int32, (N, NM), 0)   # speaker index
    lo_t = s_t * M
    mask_t_f = ((r_t >= lo_t) & (r_t < lo_t + M)).astype(jnp.float32)

    # (NM, N) mask for the own-column select / own-centroid stats.
    r = lax.broadcasted_iota(jnp.int32, (NM, N), 0)
    s = lax.broadcasted_iota(jnp.int32, (NM, N), 1)
    lo = s * M
    mask = (r >= lo) & (r < lo + M)
    mask_f = mask.astype(jnp.float32)

    # Speaker centroids (N, D) on the MXU; already in the RHS-transposed
    # layout the cross-similarity matmul consumes natively.
    cent = lax.dot_general(mask_t_f, e, (((1,), (0,)), ((), ())),
                           preferred_element_type=jnp.float32) * inv_M

    # e[k] . centroid[j] for all rows/speakers (contract dim 1 with dim 1).
    dot_cross = lax.dot_general(e, cent, (((1,), (1,)), ((), ())),
                                preferred_element_type=jnp.float32)   # (NM, N)

    # Squared norms via MXU matmuls with ones vectors (keeps the XLU free).
    ones_d = jnp.ones((D, 1), jnp.float32)
    ones_1d = jnp.ones((1, D), jnp.float32)
    ones_n = jnp.ones((N, 1), jnp.float32)
    e_nsq = lax.dot_general(e * e, ones_d, (((1,), (0,)), ((), ())),
                            preferred_element_type=jnp.float32)       # (NM, 1)
    c_nsq = lax.dot_general(ones_1d, cent * cent, (((1,), (1,)), ((), ())),
                            preferred_element_type=jnp.float32)       # (1, N)

    inv_e = lax.rsqrt(jnp.maximum(e_nsq, eps2))         # EUP rsqrt
    inv_c = lax.rsqrt(jnp.maximum(c_nsq, eps2))         # EUP rsqrt
    inv_ew = inv_e * w                                  # fold w into row scale

    # Own-centroid stats without materializing the (NM, D) exclusive centroid.
    own_dot = lax.dot_general(mask_f * dot_cross, ones_n,
                              (((1,), (0,)), ((), ())),
                              preferred_element_type=jnp.float32)     # (NM, 1)
    own_cnsq = lax.dot_general(mask_f, c_nsq, (((1,), (1,)), ((), ())),
                               preferred_element_type=jnp.float32)    # (NM, 1)

    # c_ex = (M*c_own - e) / (M - 1 + 1e-6), expanded algebraically:
    #   e . c_ex  = (M*(e.c_own) - |e|^2) * inv_Mm1
    #   |c_ex|^2  = (M^2|c_own|^2 - 2M(e.c_own) + |e|^2) * inv_Mm1^2
    # NOTE: mildly cancellation-prone in f32 when e ~= M*c_own (e.g. M == 1);
    # fine for the usual M >= 2 regime (validated against a pure-JAX ref).
    dot_self = (Mf * own_dot - e_nsq) * inv_Mm1
    cex_nsq = (Mf * Mf * own_cnsq - 2.0 * Mf * own_dot + e_nsq) * (inv_Mm1 * inv_Mm1)
    inv_cex = lax.rsqrt(jnp.maximum(cex_nsq, eps2))

    # Similarities pre-scaled by w (broadcast multiplies, no divides).
    sim_self_w = dot_self * inv_ew * inv_cex            # (NM, 1)
    sim_cross_w = dot_cross * inv_ew * inv_c            # (NM, N)

    logits = jnp.where(mask, sim_self_w, sim_cross_w) + b

    # Cross entropy with mean reduction over the N*M rows.  The target-column
    # logit is exactly w*sim_self + b, so no masked lane reduction is needed.
    tgt = sim_self_w + b                                # (NM, 1)
    mrow = jnp.max(logits, axis=1, keepdims=True)       # XLU (must stay)
    expo = jnp.exp(logits - mrow)                       # EUP
    denom = lax.dot_general(expo, ones_n, (((1,), (0,)), ((), ())),
                            preferred_element_type=jnp.float32)       # (NM, 1)
    lse = mrow + jnp.log(denom)

    per_row = lse - tgt                                 # (NM, 1)
    total = jnp.sum(per_row, axis=0, keepdims=True)     # (1, 1) sublane reduce
    loss_ref[...] = total * (1.0 / NM)


def ge2e_loss(embeddings, w, b):
    """embeddings: (N, M, D); w, b: scalar params. Returns scalar f32 loss."""
    N, M, D = embeddings.shape
    NM = N * M

    # Free reshape; keep the original dtype (cast to f32 inside the kernel) so
    # there is no extra HBM round trip and bf16 inputs DMA at half the bytes.
    e = jnp.reshape(embeddings, (NM, D))
    w1 = jnp.reshape(jnp.asarray(w, jnp.float32), (1,))
    b1 = jnp.reshape(jnp.asarray(b, jnp.float32), (1,))

    kernel = functools.partial(ge2e_kernel, N=N, M=M)
    # TODO(synk): for large N*M, row-tile over a "parallel" grid axis (two-pass
    # centroid/loss structure, scratch accumulators with pl.when init/finalize,
    # explicit vmem_limit_bytes, optional bf16 matmul operands); a single block
    # is optimal at these tiny sizes.
    out = pl.pallas_call(
        kernel,
        out_shape=jax.ShapeDtypeStruct((1, 1), jnp.float32),
        in_specs=[
            pl.BlockSpec(memory_space=pltpu.MemorySpace.VMEM),
            pl.BlockSpec(memory_space=pltpu.MemorySpace.SMEM),
            pl.BlockSpec(memory_space=pltpu.MemorySpace.SMEM),
        ],
        out_specs=pl.BlockSpec(memory_space=pltpu.MemorySpace.VMEM),
    )(e, w1, b1)
    return out[0, 0]


def ge2e_loss_ref(emb, w, b):
    """Pure-JAX reference mirroring the PyTorch GE2ELoss forward."""
    N, M, D = emb.shape
    cent = jnp.mean(emb, axis=1)                                     # (N, D)
    cent_ex = (cent[:, None, :] * M - emb) / (M - 1 + 1e-6)          # (N, M, D)
    e = emb.reshape(N * M, D)
    cex = cent_ex.reshape(N * M, D)

    def cos(x, y, axis):
        nx = jnp.maximum(jnp.sqrt(jnp.sum(x * x, axis=axis)), 1e-8)
        ny = jnp.maximum(jnp.sqrt(jnp.sum(y * y, axis=axis)), 1e-8)
        return jnp.sum(x * y, axis=axis) / (nx * ny)

    sim = cos(e[:, None, :], cent[None, :, :], axis=2)               # (NM, N)
    sim_self = cos(e, cex, axis=1)                                   # (NM,)
    spk = jnp.repeat(jnp.arange(N), M)
    sim = sim.at[jnp.arange(N * M), spk].set(sim_self)
    logits = sim * w + b
    lse = jax.scipy.special.logsumexp(logits, axis=1)
    tgt = logits[jnp.arange(N * M), spk]
    return jnp.mean(lse - tgt)


if __name__ == "__main__":
    # Deterministic parameter init matching GE2ELoss.__init__
    init_w = jnp.float32(10.0)
    init_b = jnp.float32(-5.0)

    # Small shapes consistent with the forward: N speakers, M utterances, D dims
    N, M, D = 4, 8, 32
    key = jax.random.PRNGKey(0)
    embeddings = jax.random.normal(key, (N, M, D), dtype=jnp.float32)

    loss = ge2e_loss(embeddings, init_w, init_b)
    jax.block_until_ready(loss)

    ref = ge2e_loss_ref(embeddings, init_w, init_b)
    assert jnp.isfinite(loss), "kernel produced a non-finite loss"
    assert jnp.allclose(loss, ref, rtol=2e-3, atol=2e-3), (loss, ref)
    print("KERNEL_OK")
</pallas_src>

<mosaic_0001>
module attributes {stable_mosaic.version = 11 : i64} {
  func.func @ge2e_kernel(%arg0: memref<32x32xf32, #tpu.memory_space<vmem>>, %arg1: memref<1xf32, #tpu.memory_space<smem>>, %arg2: memref<1xf32, #tpu.memory_space<smem>>, %arg3: memref<1x1xf32, #tpu.memory_space<vmem>>) attributes {dimension_semantics = [], scalar_prefetch = 0 : i64, scratch_operands = 0 : i64, tpu.core_type = #tpu.core_type<tc>} {
    %c0 = arith.constant 0 : index
    %0 = memref.load %arg1[%c0] : memref<1xf32, #tpu.memory_space<smem>>
    %c0_0 = arith.constant 0 : index
    %1 = memref.load %arg2[%c0_0] : memref<1xf32, #tpu.memory_space<smem>>
    %c0_1 = arith.constant 0 : index
    %c0_2 = arith.constant 0 : index
    %2 = vector.load %arg0[%c0_1, %c0_2] : memref<32x32xf32, #tpu.memory_space<vmem>>, vector<32x32xf32>
    %3 = tpu.iota {dimensions = array<i32: 1>} : vector<4x32xi32>
    %4 = tpu.iota {dimensions = array<i32: 0>} : vector<4x32xi32>
    %c8_i32 = arith.constant 8 : i32
    %5 = vector.broadcast %c8_i32 : i32 to vector<4x32xi32>
    %6 = arith.muli %4, %5 : vector<4x32xi32>
    %7 = arith.cmpi sge, %3, %6 : vector<4x32xi32>
    %c8_i32_3 = arith.constant 8 : i32
    %8 = vector.broadcast %c8_i32_3 : i32 to vector<4x32xi32>
    %9 = arith.addi %6, %8 : vector<4x32xi32>
    %10 = arith.cmpi slt, %3, %9 : vector<4x32xi32>
    %11 = arith.andi %7, %10 : vector<4x32xi1>
    %12 = arith.extui %11 : vector<4x32xi1> to vector<4x32xi32>
    %13 = arith.sitofp %12 : vector<4x32xi32> to vector<4x32xf32>
    %14 = tpu.iota {dimensions = array<i32: 0>} : vector<32x4xi32>
    %15 = tpu.iota {dimensions = array<i32: 1>} : vector<32x4xi32>
    %c8_i32_4 = arith.constant 8 : i32
    %16 = vector.broadcast %c8_i32_4 : i32 to vector<32x4xi32>
    %17 = arith.muli %15, %16 : vector<32x4xi32>
    %18 = arith.cmpi sge, %14, %17 : vector<32x4xi32>
    %c8_i32_5 = arith.constant 8 : i32
    %19 = vector.broadcast %c8_i32_5 : i32 to vector<32x4xi32>
    %20 = arith.addi %17, %19 : vector<32x4xi32>
    %21 = arith.cmpi slt, %14, %20 : vector<32x4xi32>
    %22 = arith.andi %18, %21 : vector<32x4xi1>
    %23 = arith.extui %22 : vector<32x4xi1> to vector<32x4xi32>
    %24 = arith.sitofp %23 : vector<32x4xi32> to vector<32x4xf32>
    %cst = arith.constant dense<0.000000e+00> : vector<4x32xf32>
    %25 = tpu.matmul %13, %2, %cst {dimension_numbers = #tpu.dot_dimension_numbers<[1], [0], [0], [1], [0, 0, 1, 1], [], []>} : vector<4x32xf32>, vector<32x32xf32>, vector<4x32xf32> -> vector<4x32xf32>
    %cst_6 = arith.constant 1.250000e-01 : f32
    %26 = vector.broadcast %cst_6 : f32 to vector<4x32xf32>
    %27 = arith.mulf %25, %26 : vector<4x32xf32>
    %cst_7 = arith.constant dense<0.000000e+00> : vector<32x4xf32>
    %28 = tpu.matmul %2, %27, %cst_7 {dimension_numbers = #tpu.dot_dimension_numbers<[1], [1], [0], [0], [0, 0, 1, 0], [], []>} : vector<32x32xf32>, vector<4x32xf32>, vector<32x4xf32> -> vector<32x4xf32>
    %cst_8 = arith.constant 1.000000e+00 : f32
    %29 = vector.broadcast %cst_8 : f32 to vector<32x1xf32>
    %cst_9 = arith.constant 1.000000e+00 : f32
    %30 = vector.broadcast %cst_9 : f32 to vector<1x32xf32>
    %cst_10 = arith.constant 1.000000e+00 : f32
    %31 = vector.broadcast %cst_10 : f32 to vector<4x1xf32>
    %32 = arith.mulf %2, %2 : vector<32x32xf32>
    %cst_11 = arith.constant dense<0.000000e+00> : vector<32x1xf32>
    %33 = tpu.matmul %32, %29, %cst_11 {dimension_numbers = #tpu.dot_dimension_numbers<[1], [0], [0], [1], [0, 0, 1, 1], [], []>} : vector<32x32xf32>, vector<32x1xf32>, vector<32x1xf32> -> vector<32x1xf32>
    %34 = arith.mulf %27, %27 : vector<4x32xf32>
    %cst_12 = arith.constant dense<0.000000e+00> : vector<1x4xf32>
    %35 = tpu.matmul %30, %34, %cst_12 {dimension_numbers = #tpu.dot_dimension_numbers<[1], [1], [0], [0], [0, 0, 1, 0], [], []>} : vector<1x32xf32>, vector<4x32xf32>, vector<1x4xf32> -> vector<1x4xf32>
    %cst_13 = arith.constant 1.000000e-16 : f32
    %36 = vector.broadcast %cst_13 : f32 to vector<32x1xf32>
    %37 = arith.maximumf %33, %36 : vector<32x1xf32>
    %38 = math.rsqrt %37 : vector<32x1xf32>
    %cst_14 = arith.constant 1.000000e-16 : f32
    %39 = vector.broadcast %cst_14 : f32 to vector<1x4xf32>
    %40 = arith.maximumf %35, %39 : vector<1x4xf32>
    %41 = math.rsqrt %40 : vector<1x4xf32>
    %42 = vector.broadcast %0 : f32 to vector<32x1xf32>
    %43 = arith.mulf %38, %42 : vector<32x1xf32>
    %44 = arith.mulf %24, %28 : vector<32x4xf32>
    %cst_15 = arith.constant dense<0.000000e+00> : vector<32x1xf32>
    %45 = tpu.matmul %44, %31, %cst_15 {dimension_numbers = #tpu.dot_dimension_numbers<[1], [0], [0], [1], [0, 0, 1, 1], [], []>} : vector<32x4xf32>, vector<4x1xf32>, vector<32x1xf32> -> vector<32x1xf32>
    %cst_16 = arith.constant dense<0.000000e+00> : vector<32x1xf32>
    %46 = tpu.matmul %24, %35, %cst_16 {dimension_numbers = #tpu.dot_dimension_numbers<[1], [1], [0], [0], [0, 0, 1, 0], [], []>} : vector<32x4xf32>, vector<1x4xf32>, vector<32x1xf32> -> vector<32x1xf32>
    %cst_17 = arith.constant 8.000000e+00 : f32
    %47 = vector.broadcast %cst_17 : f32 to vector<32x1xf32>
    %48 = arith.mulf %47, %45 : vector<32x1xf32>
    %49 = arith.subf %48, %33 : vector<32x1xf32>
    %cst_18 = arith.constant 0.142857119 : f32
    %50 = vector.broadcast %cst_18 : f32 to vector<32x1xf32>
    %51 = arith.mulf %49, %50 : vector<32x1xf32>
    %cst_19 = arith.constant 6.400000e+01 : f32
    %52 = vector.broadcast %cst_19 : f32 to vector<32x1xf32>
    %53 = arith.mulf %52, %46 : vector<32x1xf32>
    %cst_20 = arith.constant 1.600000e+01 : f32
    %54 = vector.broadcast %cst_20 : f32 to vector<32x1xf32>
    %55 = arith.mulf %54, %45 : vector<32x1xf32>
    %56 = arith.subf %53, %55 : vector<32x1xf32>
    %57 = arith.addf %56, %33 : vector<32x1xf32>
    %cst_21 = arith.constant 0.0204081573 : f32
    %58 = vector.broadcast %cst_21 : f32 to vector<32x1xf32>
    %59 = arith.mulf %57, %58 : vector<32x1xf32>
    %cst_22 = arith.constant 1.000000e-16 : f32
    %60 = vector.broadcast %cst_22 : f32 to vector<32x1xf32>
    %61 = arith.maximumf %59, %60 : vector<32x1xf32>
    %62 = math.rsqrt %61 : vector<32x1xf32>
    %63 = arith.mulf %51, %43 : vector<32x1xf32>
    %64 = arith.mulf %63, %62 : vector<32x1xf32>
    %65 = vector.broadcast %43 : vector<32x1xf32> to vector<32x4xf32>
    %66 = arith.mulf %28, %65 : vector<32x4xf32>
    %67 = vector.broadcast %41 : vector<1x4xf32> to vector<32x4xf32>
    %68 = arith.mulf %66, %67 : vector<32x4xf32>
    %69 = vector.shape_cast %64 : vector<32x1xf32> to vector<32x1xf32>
    %70 = vector.broadcast %69 : vector<32x1xf32> to vector<32x4xf32>
    %71 = arith.select %22, %70, %68 : vector<32x4xi1>, vector<32x4xf32>
    %72 = vector.broadcast %1 : f32 to vector<32x4xf32>
    %73 = arith.addf %71, %72 : vector<32x4xf32>
    %74 = vector.broadcast %1 : f32 to vector<32x1xf32>
    %75 = arith.addf %64, %74 : vector<32x1xf32>
    %cst_23 = arith.constant dense<0xFF800000> : vector<32xf32>
    %76 = vector.multi_reduction <maximumf>, %73, %cst_23 [1] : vector<32x4xf32> to vector<32xf32>
    %77 = vector.shape_cast %76 : vector<32xf32> to vector<32x1xf32>
    %78 = vector.broadcast %77 : vector<32x1xf32> to vector<32x4xf32>
    %79 = arith.subf %73, %78 : vector<32x4xf32>
    %80 = math.exp %79 : vector<32x4xf32>
    %cst_24 = arith.constant dense<0.000000e+00> : vector<32x1xf32>
    %81 = tpu.matmul %80, %31, %cst_24 {dimension_numbers = #tpu.dot_dimension_numbers<[1], [0], [0], [1], [0, 0, 1, 1], [], []>} : vector<32x4xf32>, vector<4x1xf32>, vector<32x1xf32> -> vector<32x1xf32>
    %82 = math.log %81 : vector<32x1xf32>
    %83 = arith.addf %77, %82 : vector<32x1xf32>
    %84 = arith.subf %83, %75 : vector<32x1xf32>
    %cst_25 = arith.constant dense<0.000000e+00> : vector<1xf32>
    %85 = vector.multi_reduction <add>, %84, %cst_25 [0] : vector<32x1xf32> to vector<1xf32>
    %86 = vector.shape_cast %85 : vector<1xf32> to vector<1x1xf32>
    %cst_26 = arith.constant 3.125000e-02 : f32
    %87 = vector.broadcast %cst_26 : f32 to vector<1x1xf32>
    %88 = arith.mulf %86, %87 : vector<1x1xf32>
    %c0_27 = arith.constant 0 : index
    %c0_28 = arith.constant 0 : index
    %89 = vector.load %arg3[%c0_27, %c0_28] : memref<1x1xf32, #tpu.memory_space<vmem>>, vector<1x1xf32>
    tpu.vector_store %arg3[%c0_27, %c0_28], %88 {strides = array<i32>} : memref<1x1xf32, #tpu.memory_space<vmem>>, vector<1x1xf32>,
    return
  }
}

</mosaic_0001>

<bundles_post_ra>
// kernel: tpu_custom_call.1
= control target key start
LH: loop header
LB: loop body
LE: loop exit
PB: predicated region body
PF: predicated region fallthrough
CT: control target
= control target key end

     0   :  { %10 = vsyncpa [#allocation5], 0  ;;  %s960_s0 = inlined_call_operand.hbm [shape: f32[32,32], index: 0, kind: input, shape index: {}]   ;;  %s961_s1 = inlined_call_operand.<no memory space> [shape: f32[1], index: 1, kind: input, shape index: {}]   ;;  %s962_s2 = inlined_call_operand.<no memory space> [shape: f32[1], index: 2, kind: input, shape index: {}]   ;;  %s963_s3 = inlined_call_operand.hbm [shape: f32[1,1], index: 3, kind: output, shape index: {}]  }
   0x1   :  { %11 = vsyncpa [#allocation6], 0  ;;  %s16_s14 = sshll.u32 %s960_s0, 4  ;;  %s726_s15 = smov [#allocation4]   ;;  %s17_s14 = int_to_ptr.hbm [resolvable:$true] %s16_s14 }
   0x2   :  { %s18_s16 = sshll.u32 %s726_s15, 4  ;;  %s727_s17 = smov 128   ;;  %s19_s16 = int_to_ptr.vmem [resolvable:$true] %s18_s16 }
   0x3   :  { %s728_s18 = smov 8  }
   0x4   :  { %24 = dma.hbm_to_vmem [thread:$0]  %s17_s14, 512, %s19_s16, [#allocation5], %s727_s17, %s727_s17, %s728_s18  }
   0x5   :  { %722 = dma.done.wait [#allocation5], 512  }
   0x6   :  { %723 = vsyncadd [#allocation5], 4294966784  ;;  %v39_v0 = vlaneseq  ;;  %v729_v1 = vmov 1.0   ;;  %v38_v6 = vld [vmem:[#allocation4 + $0x18] sm:$0xff]  ;;  %v37_v7 = vld [vmem:[#allocation4 + $0x10] sm:$0xff]  ;;  %vm75_vm3 = vcmask 261120   ;;  %v774_v26 = vstv %s961_s1 }
   0x7   :  { %172 = vmatpush.msra.mxu2 %v729_v1  ;;  %91 = vmatpush.msra.mxu0 %v38_v6  ;;  %v35_v8 = vld [vmem:[#allocation4] sm:$0xff]  ;;  %v36_v9 = vld [vmem:[#allocation4 + $0x8] sm:$0xff]  ;;  %v730_v11 = vmov 0.0   ;;  %v731_v14 = vmov 0   ;;  %vm293_vm4 = vcmask 1043456   ;;  %v146_v29 = vmul.f32 %v37_v7, %v37_v7  ;;  %s593_s24 = sshll.u32 %s963_s3, 4  ;;  %s594_s24 = int_to_ptr.hbm [resolvable:$true] %s593_s24 }
   0x8   :  { %v40_v2 = vand.u32 127, %v39_v0  ;;  %v756_v3 = vshrl.u32 %v39_v0, 7  ;;  %v144_v10 = vmul.f32 %v35_v8, %v35_v8  ;;  %v145_v13 = vmul.f32 %v36_v9, %v36_v9  ;;  %637 = vset.pattern.permute.xlu2 %v731_v14  ;;  %638 = vset.pattern.permute.xlu0 %v731_v14 }
   0x9   :  { %173 = vmatpush.msra.mxu2 %v729_v1  ;;  %92 = vmatpush.msra.mxu0 %v37_v7  ;;  %v147_v32 = vmul.f32 %v38_v6, %v38_v6  ;;  %vm280_vm11 = vcmask 31744  }
   0xa   :  { %v43_v4 = vmul.u32 8, %v756_v3  ;;  %639 = vset.pattern.permute.xlu1 %v731_v14  ;;  %v53_v30 = vmul.u32 8, %v40_v2  ;;  %v50_v34 = vadd.s32 8, %v756_v3  ;;  %v51_v36 = vadd.s32 16, %v756_v3 }
   0xb   :  { %174 = vmatpush.msra.mxu2 %v729_v1  ;;  %93 = vmatpush.msra.mxu0 %v36_v9  ;;  %v52_v42 = vadd.s32 24, %v756_v3 }
   0xc   :  { %vm44_vm0 = vcmp.ge.s32.totalorder %v40_v2, %v43_v4  ;;  %v45_v5 = vadd.s32 8, %v43_v4  ;;  %v58_v31 = vadd.s32 8, %v53_v30  ;;  %vm54_vm8 = vcmp.ge.s32.totalorder %v756_v3, %v53_v30 }
   0xd   :  { %175 = vmatpush.msra.mxu2 %v729_v1  ;;  %94 = vmatpush.msra.mxu0 %v35_v8  ;;  %vm55_vm12 = vcmp.ge.s32.totalorder %v50_v34, %v53_v30  ;;  %vm56_vm14 = vcmp.ge.s32.totalorder %v51_v36, %v53_v30 }
   0xe   :  { %vm46_vm1 = vcmp.lt.s32.totalorder %v40_v2, %v45_v5  ;;  %614 = vmatmul.msk.f32.vlgmr.msra.gmra.mxu2 %vm75_vm3, %v144_v10  ;;  %vm59_vm9 = vcmp.lt.s32.totalorder %v756_v3, %v58_v31  ;;  %vm60_vm13 = vcmp.lt.s32.totalorder %v50_v34, %v58_v31  ;;  %vm61_vm15 = vcmp.lt.s32.totalorder %v51_v36, %v58_v31 }
   0xf   :  { %vm47_vm2 = vmand %vm44_vm0, %vm46_vm1  ;;  %625 = vmatpush.msk.msrb.mxu0 %vm293_vm4, %v729_v1 }
  0x10   :  { %v603_v12 = vsel %vm47_vm2, 1.0, %v730_v11  ;;  %vm786_vm10 = vmand %vm54_vm8, %vm59_vm9  ;;  %vm57_vm2 = vcmp.ge.s32.totalorder %v52_v42, %v53_v30 }
  0x11   :  { %608 = vmatmul.msk.f32.vlgmr.msra.gmra.mxu0 %vm75_vm3, %v603_v12  ;;  %v604_v35 = vsel %vm786_vm10, 1.0, %v730_v11  ;;  %vm802_vm0 = vmand %vm55_vm12, %vm60_vm13 }
  0x12   :  { %vm807_vm1 = vmand %vm56_vm14, %vm61_vm15  ;;  %v605_v44 = vsel %vm802_vm0, 1.0, %v730_v11 }
  0x13   :  { %v606_v47 = vsel %vm807_vm1, 1.0, %v730_v11 }
  0x16   :  { %615 = vmatmul.msk.f32.gmra.mxu2 %vm75_vm3, %v145_v13 }
  0x1e   :  { %616 = vmatmul.msk.f32.gmra.mxu2 %vm75_vm3, %v146_v29 }
  0x26   :  { %617 = vmatmul.msk.f32.gmra.mxu2 %vm75_vm3, %v147_v32 }
  0x8e   :  { %v96_v15 = vpop.f32.mrf.mxu0 }
  0x8f   :  { %v99_v16 = vmul.f32 0.125, %v96_v15 }
  0x91   :  { %v763_v17 = vpop.f32.mrf.mxu2  ;;  %609 = vmatpush.xpose.msk.msra.mxu1 %vm75_vm3, %v99_v16  ;;  %v189_v18 = vmul.f32 %v99_v16, %v99_v16 }
  0x92   :  { %v216_v19 = vmax.f32 %v763_v17, 1e-16 }
  0x93   :  { %618 = vmatpush.xpose.msk.msra.mxu3 %vm75_vm3, %v189_v18 }
  0x94   :  { %640 = vrsqrt.f32 %v216_v19  ;;  %610 = vmatmul.msk.f32.vlgmr.msra.gmra.mxu1 %vm75_vm3, %v35_v8  ;;  %vm226_vm5 = vweird.f32 %v216_v19 }
  0x96   :  { %619 = vmatmul.msk.f32.vlgmr.msra.gmra.mxu3 %vm75_vm3, %v729_v1 }
  0x97   :  { %620 = vmatpush.msk.msrb.mxu3 %vm293_vm4, %v729_v1 }
  0x99   :  { %v795_v37 = vpop.f32.mrf.mxu2 }
  0x9a   :  { %v641_v20 = vpop.eup %640  ;;  %v217_v40 = vmax.f32 %v795_v37, 1e-16 }
  0x9b   :  { %v221_v21 = vmul.f32 %v641_v20, %v216_v19  ;;  %vm227_vm6 = vweird.f32 %v641_v20 }
  0x9c   :  { %611 = vmatmul.msk.f32.gmra.mxu1 %vm75_vm3, %v36_v9  ;;  %vm228_vm7 = vmor %vm226_vm5, %vm227_vm6  ;;  %642 = vrsqrt.f32 %v217_v40  ;;  %vm236_vm5 = vweird.f32 %v217_v40 }
  0x9d   :  { %v222_v22 = vmul.f32 %v641_v20, %v221_v21 }
  0x9f   :  { %v223_v23 = vmul.f32 0.5, %v222_v22 }
  0xa1   :  { %v224_v24 = vsub.f32 1.5, %v223_v23  ;;  %v847_v9 = vpop.f32.mrf.mxu2 }
  0xa2   :  { %v643_v53 = vpop.eup %642 }
  0xa3   :  { %v225_v25 = vmul.f32 %v641_v20, %v224_v24  ;;  %v231_v57 = vmul.f32 %v643_v53, %v217_v40  ;;  %vm237_vm6 = vweird.f32 %v643_v53 }
  0xa4   :  { %612 = vmatmul.msk.f32.gmra.mxu1 %vm75_vm3, %v37_v7 }
  0xa5   :  { %v229_v27 = vsel %vm228_vm7, %v641_v20, %v225_v25  ;;  %v232_v62 = vmul.f32 %v643_v53, %v231_v57  ;;  %vm238_vm7 = vmor %vm236_vm5, %vm237_vm6 }
  0xa6   :  { %v778_v28 = vmul.f32 %v774_v26, %v229_v27 }
  0xa7   :  { %v233_v1 = vmul.f32 0.5, %v232_v62 }
  0xa8   :  { %428 = vperm.xlu2 %637, %v778_v28  }
  0xa9   :  { %v234_v4 = vsub.f32 1.5, %v233_v1  ;;  %v854_v18 = vpop.f32.mrf.mxu2 }
  0xaa   :  { %v859_v25 = vmax.f32 %v854_v18, 1e-16 }
  0xab   :  { %v235_v5 = vmul.f32 %v643_v53, %v234_v4 }
  0xac   :  { %613 = vmatmul.msk.f32.gmra.mxu1 %vm75_vm3, %v38_v6  ;;  %vm62_vm3 = vcmp.lt.s32.totalorder %v52_v42, %v58_v31  ;;  %vm256_vm6 = vweird.f32 %v859_v25 }
  0xad   :  { %vm824_vm4 = vmand %vm57_vm2, %vm62_vm3  ;;  %v239_v6 = vsel %vm238_vm7, %v643_v53, %v235_v5 }
  0xae   :  { %v607_v56 = vsel %vm824_vm4, 1.0, %v730_v11  ;;  %v844_v7 = vmul.f32 %v774_v26, %v239_v6  ;;  %v850_v11 = vmax.f32 %v847_v9, 1e-16 }
  0xb0   :  { %644 = vrsqrt.f32 %v850_v11  ;;  %vm246_vm8 = vweird.f32 %v850_v11 }
  0xb6   :  { %v856_v21 = vpop.eup %644 }
  0xb7   :  { %v241_v30 = vmul.f32 %v856_v21, %v850_v11  ;;  %vm247_vm12 = vweird.f32 %v856_v21 }
  0xb8   :  { %vm888_vm15 = vmor %vm246_vm8, %vm247_vm12 }
 0x111   :  { %v797_v38 = vpop.f32.mrf.mxu1 }
 0x112   :  { %v276_v39 = vmul.f32 %v604_v35, %v797_v38 }
 0x114   :  { %621 = vmatmul.msk.f32.vlgmr.msrb.gmra.mxu3 %vm280_vm11, %v276_v39 }
 0x119   :  { %v814_v45 = vpop.f32.mrf.mxu1  ;;  %v816_v46 = vpop.f32.mrf.mxu3 }
 0x11a   :  { %v277_v48 = vmul.f32 %v605_v44, %v814_v45  ;;  %v325_v49 = vperm.slane %v816_v46, 0 }
 0x11c   :  { %622 = vmatmul.msk.f32.gmra.mxu3 %vm280_vm11, %v277_v48  ;;  %v328_v50 = vmul.f32 %v606_v47, %v325_v49  ;;  %v326_v51 = vmul.f32 %v604_v35, %v325_v49  ;;  %v329_v60 = vmul.f32 %v607_v56, %v325_v49  ;;  %v327_v61 = vmul.f32 %v605_v44, %v325_v49 }
 0x11d   :  { %v242_v35 = vmul.f32 %v856_v21, %v241_v30 }
 0x11e   :  { %v336_v54 = vsel %vm280_vm11, %v328_v50, 0.0  ;;  %v330_v55 = vsel %vm280_vm11, %v326_v51, 0.0  ;;  %v339_v63 = vsel %vm280_vm11, %v329_v60, 0.0  ;;  %v333_v0 = vsel %vm280_vm11, %v327_v61, 0.0 }
 0x11f   :  { %337 = vadd.xlane.f32.xlu1 %v336_v54  ;;  %331 = vadd.xlane.f32.xlu0 %v330_v55  ;;  %v243_v51 = vmul.f32 0.5, %v242_v35 }
 0x121   :  { %v833_v58 = vpop.f32.mrf.mxu1  ;;  %v244_v62 = vsub.f32 1.5, %v243_v51 }
 0x122   :  { %v278_v59 = vmul.f32 %v606_v47, %v833_v58 }
 0x124   :  { %623 = vmatmul.msk.f32.gmra.mxu3 %vm280_vm11, %v278_v59 }
 0x127   :  { %340 = vadd.xlane.f32.xlu1 %v339_v63  ;;  %334 = vadd.xlane.f32.xlu0 %v333_v0 }
 0x129   :  { %v839_v2 = vpop.f32.mrf.mxu1 }
 0x12a   :  { %v279_v3 = vmul.f32 %v607_v56, %v839_v2 }
 0x12c   :  { %624 = vmatmul.msk.f32.gmra.mxu3 %vm280_vm11, %v279_v3 }
 0x13b   :  { %433 = vperm.xlu0 %638, %v844_v7  }
 0x192   :  { %v332_v8 = vpop.xlane.xlu0 %331  ;;  %v338_v29 = vpop.xlane.xlu1 %337 }
 0x193   :  { %v354_v10 = vmul.f32 64.0, %v332_v8  ;;  %v356_v40 = vmul.f32 64.0, %v338_v29 }
 0x197   :  { %v313_v12 = vpop.f32.mrf.mxu3 }
 0x198   :  { %v358_v13 = vmul.f32 16.0, %v313_v12  ;;  %v342_v32 = vmul.f32 8.0, %v313_v12 }
 0x19a   :  { %v362_v14 = vsub.f32 %v354_v10, %v358_v13  ;;  %v335_v16 = vpop.xlane.xlu0 %334  ;;  %v346_v49 = vsub.f32 %v342_v32, %v763_v17  ;;  %v341_v55 = vpop.xlane.xlu1 %340 }
 0x19b   :  { %v355_v23 = vmul.f32 64.0, %v335_v16  ;;  %v357_v1 = vmul.f32 64.0, %v341_v55 }
 0x19c   :  { %v366_v15 = vadd.f32 %v362_v14, %v763_v17  ;;  %v350_v59 = vmul.f32 0.14285712, %v346_v49 }
 0x19e   :  { %v370_v19 = vmul.f32 0.020408157, %v366_v15  ;;  %v418_v13 = vmul.f32 %v350_v59, %v778_v28 }
 0x19f   :  { %v316_v20 = vpop.f32.mrf.mxu3 }
 0x1a0   :  { %v374_v22 = vmax.f32 %v370_v19, 1e-16  ;;  %v359_v24 = vmul.f32 16.0, %v316_v20  ;;  %v343_v60 = vmul.f32 8.0, %v316_v20  ;;  %v245_v20 = vmul.f32 %v856_v21, %v244_v62 }
 0x1a2   :  { %646 = vrsqrt.f32 %v374_v22  ;;  %v363_v27 = vsub.f32 %v355_v23, %v359_v24  ;;  %vm384_vm13 = vweird.f32 %v374_v22  ;;  %v347_v10 = vsub.f32 %v343_v60, %v795_v37 }
 0x1a3   :  { %648 = vrsqrt.f32 %v859_v25 }
 0x1a4   :  { %v367_v31 = vadd.f32 %v363_v27, %v795_v37  ;;  %v351_v24 = vmul.f32 0.14285712, %v347_v10 }
 0x1a6   :  { %v371_v34 = vmul.f32 0.020408157, %v367_v31  ;;  %v249_v31 = vsel %vm888_vm15, %v856_v21, %v245_v20  ;;  %v419_v35 = vmul.f32 %v351_v24, %v844_v7 }
 0x1a7   :  { %v866_v36 = vpop.f32.mrf.mxu3 }
 0x1a8   :  { %v647_v39 = vpop.eup %646  ;;  %v375_v42 = vmax.f32 %v371_v34, 1e-16  ;;  %v360_v44 = vmul.f32 16.0, %v866_v36 }
 0x1a9   :  { %v379_v47 = vmul.f32 %v647_v39, %v374_v22  ;;  %v869_v48 = vpop.eup %648  ;;  %vm385_vm9 = vweird.f32 %v647_v39 }
 0x1aa   :  { %650 = vrsqrt.f32 %v375_v42  ;;  %v364_v50 = vsub.f32 %v356_v40, %v360_v44  ;;  %v251_v56 = vmul.f32 %v869_v48, %v859_v25  ;;  %vm386_vm14 = vmor %vm384_vm13, %vm385_vm9  ;;  %vm394_vm3 = vweird.f32 %v375_v42 }
 0x1ab   :  { %v380_v53 = vmul.f32 %v647_v39, %v379_v47  ;;  %vm257_vm7 = vweird.f32 %v869_v48  ;;  %v274_v44 = vmul.f32 %v774_v26, %v249_v31 }
 0x1ac   :  { %v368_v54 = vadd.f32 %v364_v50, %v847_v9  ;;  %v252_v6 = vmul.f32 %v869_v48, %v251_v56  ;;  %v344_v50 = vmul.f32 8.0, %v866_v36  ;;  %vm258_vm8 = vmor %vm256_vm6, %vm257_vm7 }
 0x1ad   :  { %v381_v57 = vmul.f32 0.5, %v380_v53 }
 0x1ae   :  { %v372_v61 = vmul.f32 0.020408157, %v368_v54  ;;  %v253_v23 = vmul.f32 0.5, %v252_v6  ;;  %v348_v53 = vsub.f32 %v344_v50, %v847_v9 }
 0x1af   :  { %v322_v63 = vpop.f32.mrf.mxu3  ;;  %v382_v0 = vsub.f32 1.5, %v381_v57 }
 0x1b0   :  { %v651_v17 = vpop.eup %650  ;;  %v376_v3 = vmax.f32 %v372_v61, 1e-16  ;;  %v361_v4 = vmul.f32 16.0, %v322_v63  ;;  %v254_v34 = vsub.f32 1.5, %v253_v23  ;;  %v352_v59 = vmul.f32 0.14285712, %v348_v53 }
 0x1b1   :  { %v389_v5 = vmul.f32 %v651_v17, %v375_v42  ;;  %v383_v8 = vmul.f32 %v647_v39, %v382_v0  ;;  %vm395_vm2 = vweird.f32 %v651_v17  ;;  %v345_v60 = vmul.f32 8.0, %v322_v63 }
 0x1b2   :  { %652 = vrsqrt.f32 %v376_v3  ;;  %v365_v12 = vsub.f32 %v357_v1, %v361_v4  ;;  %vm396_vm5 = vmor %vm394_vm3, %vm395_vm2  ;;  %v255_v21 = vmul.f32 %v869_v48, %v254_v34  ;;  %vm404_vm12 = vweird.f32 %v376_v3 }
 0x1b3   :  { %v387_v14 = vsel %vm386_vm14, %v647_v39, %v383_v8  ;;  %v390_v15 = vmul.f32 %v651_v17, %v389_v5  ;;  %v349_v62 = vsub.f32 %v345_v60, %v854_v18  ;;  %v420_v0 = vmul.f32 %v352_v59, %v274_v44 }
 0x1b4   :  { %v369_v16 = vadd.f32 %v365_v12, %v854_v18  ;;  %v881_v19 = vmul.f32 %v418_v13, %v387_v14  ;;  %v259_v25 = vsel %vm258_vm8, %v869_v48, %v255_v21  ;;  %v429_v12 = vpop.permute.xlu2 %428 }
 0x1b5   :  { %v391_v22 = vmul.f32 0.5, %v390_v15  ;;  %v275_v55 = vmul.f32 %v774_v26, %v259_v25  ;;  %v353_v9 = vmul.f32 0.14285712, %v349_v62  ;;  %v446_v15 = vmul.f32 %v429_v12, %v797_v38 }
 0x1b6   :  { %v373_v28 = vmul.f32 0.020408157, %v369_v16  ;;  %457 = vperm.xlu2 %637, %v881_v19  }
 0x1b7   :  { %v392_v27 = vsub.f32 1.5, %v391_v22  ;;  %v421_v1 = vmul.f32 %v353_v9, %v275_v55 }
 0x1b8   :  { %v653_v29 = vpop.eup %652  ;;  %v377_v30 = vmax.f32 %v373_v28, 1e-16 }
 0x1b9   :  { %v399_v32 = vmul.f32 %v653_v29, %v376_v3  ;;  %v393_v11 = vmul.f32 %v651_v17, %v392_v27  ;;  %vm405_vm9 = vweird.f32 %v653_v29  ;;  %v260_v3 = vmax.f32 %v816_v46, 1e-16 }
 0x1ba   :  { %654 = vrsqrt.f32 %v377_v30  ;;  %vm406_vm13 = vmor %vm404_vm12, %vm405_vm9  ;;  %vm414_vm15 = vweird.f32 %v377_v30  ;;  %v920_v46 = vstv %s962_s2  ;;  %s732_s2 = smov [#allocation7]  }
 0x1bb   :  { %v397_v39 = vsel %vm396_vm5, %v651_v17, %v393_v11  ;;  %v400_v40 = vmul.f32 %v653_v29, %v399_v32  ;;  %656 = vrsqrt.f32 %v260_v3  ;;  %vm267_vm5 = vweird.f32 %v260_v3  ;;  %s591_s21 = sshll.u32 %s732_s2, 4  ;;  %s592_s21 = int_to_ptr.vmem [resolvable:$true] %s591_s21 }
 0x1bc   :  { %v900_v47 = vmul.f32 %v419_v35, %v397_v39 }
 0x1bd   :  { %v401_v49 = vmul.f32 0.5, %v400_v40 }
 0x1be   :  { %438 = vperm.xlu2 %637, %v274_v44   ;;  %462 = vperm.xlu1 %639, %v900_v47  }
 0x1bf   :  { %v402_v51 = vsub.f32 1.5, %v401_v49 }
 0x1c0   :  { %v655_v7 = vpop.eup %654 }
 0x1c1   :  { %v409_v42 = vmul.f32 %v655_v7, %v377_v30  ;;  %v403_v56 = vmul.f32 %v653_v29, %v402_v51  ;;  %vm415_vm14 = vweird.f32 %v655_v7  ;;  %v657_v18 = vpop.eup %656 }
 0x1c2   :  { %vm416_vm2 = vmor %vm414_vm15, %vm415_vm14  ;;  %v262_v4 = vmul.f32 %v657_v18, %v260_v3  ;;  %vm268_vm3 = vweird.f32 %v657_v18  ;;  %v484_v3 = vadd.f32 %v920_v46, %v881_v19 }
 0x1c3   :  { %v410_v54 = vmul.f32 %v655_v7, %v409_v42  ;;  %v407_v36 = vsel %vm406_vm13, %v653_v29, %v403_v56  ;;  %vm269_vm6 = vmor %vm267_vm5, %vm268_vm3  ;;  %v434_v29 = vpop.permute.xlu0 %433 }
 0x1c4   :  { %v909_v48 = vmul.f32 %v420_v0, %v407_v36  ;;  %v263_v5 = vmul.f32 %v657_v18, %v262_v4  ;;  %v447_v33 = vmul.f32 %v434_v29, %v814_v45 }
 0x1c5   :  { %v411_v57 = vmul.f32 0.5, %v410_v54 }
 0x1c6   :  { %443 = vperm.xlu2 %637, %v275_v55   ;;  %v264_v6 = vmul.f32 0.5, %v263_v5  ;;  %v485_v5 = vadd.f32 %v920_v46, %v900_v47  ;;  %v486_v19 = vadd.f32 %v920_v46, %v909_v48 }
 0x1c7   :  { %v412_v61 = vsub.f32 1.5, %v411_v57 }
 0x1c8   :  { %v265_v8 = vsub.f32 1.5, %v264_v6 }
 0x1c9   :  { %v413_v17 = vmul.f32 %v655_v7, %v412_v61 }
 0x1ca   :  { %v266_v10 = vmul.f32 %v657_v18, %v265_v8 }
 0x1cb   :  { %v417_v26 = vsel %vm416_vm2, %v655_v7, %v413_v17 }
 0x1cc   :  { %v912_v63 = vmul.f32 %v421_v1, %v417_v26  ;;  %v270_v13 = vsel %vm269_vm6, %v657_v18, %v266_v10 }
 0x1cd   :  { %v450_v14 = vperm.slane %v270_v13, 0 }
 0x1ce   :  { %467 = vperm.xlu2 %637, %v909_v48  }
 0x1cf   :  { %v451_v16 = vmul.f32 %v450_v14, %v446_v15  ;;  %v452_v35 = vmul.f32 %v450_v14, %v447_v33 }
 0x1d6   :  { %472 = vperm.xlu2 %637, %v912_v63  }
 0x210   :  { %v458_v20 = vpop.permute.xlu2 %457 }
 0x211   :  { %v475_v23 = vsel %vm786_vm10, %v458_v20, %v451_v16  ;;  %vm569_vm10 = vcmask 7168  }
 0x212   :  { %v480_v37 = vadd.f32 %v920_v46, %v475_v23 }
 0x214   :  { %v488_v22 = vsel %vm280_vm11, %v480_v37, -inf }
 0x215   :  { %489 = vmax.xlane.f32.xlu1 %v488_v22 }
 0x218   :  { %v439_v24 = vpop.permute.xlu2 %438 }
 0x219   :  { %v448_v27 = vmul.f32 %v439_v24, %v833_v58 }
 0x21b   :  { %v453_v38 = vmul.f32 %v450_v14, %v448_v27  ;;  %v487_v27 = vadd.f32 %v920_v46, %v912_v63 }
 0x220   :  { %v444_v28 = vpop.permute.xlu2 %443 }
 0x221   :  { %v449_v34 = vmul.f32 %v444_v28, %v839_v2 }
 0x223   :  { %v454_v39 = vmul.f32 %v450_v14, %v449_v34 }
 0x228   :  { %v468_v30 = vpop.permute.xlu2 %467 }
 0x229   :  { %v477_v31 = vsel %vm807_vm1, %v468_v30, %v453_v38 }
 0x22a   :  { %v482_v32 = vadd.f32 %v920_v46, %v477_v31 }
 0x22c   :  { %v494_v11 = vsel %vm280_vm11, %v482_v32, -inf }
 0x22d   :  { %495 = vmax.xlane.f32.xlu0 %v494_v11 }
 0x230   :  { %v463_v40 = vpop.permute.xlu1 %462  ;;  %v473_v44 = vpop.permute.xlu2 %472 }
 0x231   :  { %v476_v58 = vsel %vm802_vm0, %v463_v40, %v452_v35  ;;  %v478_v43 = vsel %vm824_vm4, %v473_v44, %v454_v39 }
 0x232   :  { %v481_v21 = vadd.f32 %v920_v46, %v476_v58  ;;  %v483_v49 = vadd.f32 %v920_v46, %v478_v43 }
 0x234   :  { %v491_v45 = vsel %vm280_vm11, %v481_v21, -inf  ;;  %v497_v2 = vsel %vm280_vm11, %v483_v49, -inf }
 0x235   :  { %492 = vmax.xlane.f32.xlu2 %v491_v45  ;;  %498 = vmax.xlane.f32.xlu1 %v497_v2 }
 0x288   :  { %v490_v50 = vpop.xlane.xlu1 %489 }
 0x289   :  { %v500_v7 = vsub.f32 %v480_v37, %v490_v50 }
 0x28b   :  { %v504_v42 = vmul.f32 1.442695, %v500_v7 }
 0x28d   :  { %658 = vpow2.f32 %v504_v42 }
 0x293   :  { %v659_v25 = vpop.eup %658 }
 0x294   :  { %626 = vmatmul.msk.f32.vlgmr.msrb.gmra.mxu0 %vm280_vm11, %v659_v25 }
 0x2a0   :  { %v496_v51 = vpop.xlane.xlu0 %495 }
 0x2a1   :  { %v502_v54 = vsub.f32 %v482_v32, %v496_v51 }
 0x2a3   :  { %v508_v55 = vmul.f32 1.442695, %v502_v54 }
 0x2a8   :  { %v493_v41 = vpop.xlane.xlu2 %492  ;;  %v499_v56 = vpop.xlane.xlu1 %498 }
 0x2a9   :  { %v501_v52 = vsub.f32 %v481_v21, %v493_v41  ;;  %v503_v59 = vsub.f32 %v483_v49, %v499_v56 }
 0x2ab   :  { %v506_v53 = vmul.f32 1.442695, %v501_v52  ;;  %v510_v60 = vmul.f32 1.442695, %v503_v59 }
 0x2ad   :  { %660 = vpow2.f32 %v506_v53 }
 0x2ae   :  { %662 = vpow2.f32 %v508_v55 }
 0x2af   :  { %664 = vpow2.f32 %v510_v60 }
 0x2b3   :  { %v661_v57 = vpop.eup %660 }
 0x2b4   :  { %627 = vmatmul.msk.f32.gmra.mxu0 %vm280_vm11, %v661_v57  ;;  %v663_v36 = vpop.eup %662 }
 0x2b5   :  { %v665_v61 = vpop.eup %664 }
 0x2bc   :  { %628 = vmatmul.msk.f32.gmra.mxu0 %vm280_vm11, %v663_v36 }
 0x2c4   :  { %629 = vmatmul.msk.f32.gmra.mxu0 %vm280_vm11, %v665_v61  ;;  %vm584_vm11 = vcmask 0  }
 0x311   :  { %v541_v62 = vpop.f32.mrf.mxu0 }
 0x312   :  { %666 = vlog2.f32 %v541_v62 }
 0x318   :  { %v667_v0 = vpop.eup %666 }
 0x319   :  { %v554_v9 = vmul.f32 0.6931472, %v667_v0 }
 0x31b   :  { %v561_v26 = vadd.f32 %v554_v9, %v490_v50 }
 0x31d   :  { %v565_v6 = vsub.f32 %v561_v26, %v484_v3 }
 0x31f   :  { %v570_v12 = vsel %vm569_vm10, %v565_v6, 0.0 }
 0x331   :  { %v544_v17 = vpop.f32.mrf.mxu0 }
 0x332   :  { %668 = vlog2.f32 %v544_v17 }
 0x338   :  { %v669_v1 = vpop.eup %668 }
 0x339   :  { %v556_v18 = vmul.f32 0.6931472, %v669_v1  ;;  %v547_v4 = vpop.f32.mrf.mxu0 }
 0x33a   :  { %670 = vlog2.f32 %v547_v4 }
 0x33b   :  { %v562_v8 = vadd.f32 %v556_v18, %v493_v41 }
 0x33d   :  { %v566_v10 = vsub.f32 %v562_v8, %v485_v5 }
 0x33f   :  { %v571_v13 = vsel %vm569_vm10, %v566_v10, 0.0 }
 0x340   :  { %v671_v14 = vpop.eup %670  ;;  %v572_v15 = vadd.f32 %v571_v13, %v570_v12 }
 0x341   :  { %v558_v16 = vmul.f32 0.6931472, %v671_v14  ;;  %v550_v20 = vpop.f32.mrf.mxu0 }
 0x342   :  { %672 = vlog2.f32 %v550_v20 }
 0x343   :  { %v563_v23 = vadd.f32 %v558_v16, %v496_v51 }
 0x345   :  { %v567_v37 = vsub.f32 %v563_v23, %v486_v19 }
 0x347   :  { %v573_v47 = vsel %vm569_vm10, %v567_v37, 0.0 }
 0x348   :  { %v673_v22 = vpop.eup %672  ;;  %v574_v24 = vadd.f32 %v573_v47, %v572_v15 }
 0x349   :  { %v560_v28 = vmul.f32 0.6931472, %v673_v22 }
 0x34b   :  { %v564_v38 = vadd.f32 %v560_v28, %v499_v56 }
 0x34d   :  { %v568_v29 = vsub.f32 %v564_v38, %v487_v27 }
 0x34f   :  { %v575_v30 = vsel %vm569_vm10, %v568_v29, 0.0 }
 0x350   :  { %v576_v31 = vadd.f32 %v575_v30, %v574_v24 }
 0x352   :  { %v577_v32 = vrot.slane %v576_v31, 4 }
 0x354   :  { %v578_v33 = vadd.f32 %v577_v32, %v576_v31 }
 0x356   :  { %v579_v34 = vrot.slane %v578_v33, 2 }
 0x358   :  { %v580_v11 = vadd.f32 %v579_v34, %v578_v33 }
 0x35a   :  { %v581_v48 = vrot.slane %v580_v11, 1 }
 0x35c   :  { %v582_v35 = vadd.f32 %v581_v48, %v580_v11 }
 0x35e   :  { %v583_v39 = vmul.f32 0.03125, %v582_v35 }
 0x360   :  { %585 = vst.msk [vmem:[#allocation7] sm:$0x1] %vm584_vm11, %v583_v39 }
 0x361   :  { %596 = dma.vmem_to_hbm [thread:$0]  %s592_s21, 16, %s594_s24, [#allocation6]  }
 0x362   :  { %724 = dma.done.wait [#allocation6], 16  }
 0x363   :  { %725 = vsyncadd [#allocation6], 4294967280 }
 0x364   :  { %601 = vsyncpa [#allocation5], 1 }
 0x365   :  { %602 = vsyncpa [#allocation6], 1 }

</bundles_post_ra>
